<compile_context>
chip_gen: v7x
topology: tpu7x:2x2x1
jax: 0.10.0
libtpu: 0.0.40
codegen_flags: <defaults>
</compile_context>

<pallas_src>
import functools

import jax
import jax.numpy as jnp
from jax import lax
from jax.experimental import pallas as pl
from jax.experimental.pallas import tpu as pltpu


def _mean_variance_kernel(x_ref, t_ref, w_ref, mean_out_ref, var_out_ref,
                          acc_mse_ref, acc_var_ref, *,
                          block_rows, total_n, age_center, needs_mask):
    c = pl.program_id(0)          # split index ("parallel" axis, v7x dual-TC)
    i = pl.program_id(1)          # step within this split ("arbitrary" axis)

    @pl.when(i == 0)
    def _init():
        acc_mse_ref[...] = jnp.zeros_like(acc_mse_ref)
        acc_var_ref[...] = jnp.zeros_like(acc_var_ref)

    x = x_ref[...].astype(jnp.float32)            # (TM, C) logits
    t = t_ref[...].astype(jnp.float32)            # (1, TM) targets, lane-dense

    # Numerically stable UNNORMALIZED softmax weights.
    x_max = jnp.max(x, axis=-1, keepdims=True)    # (TM, 1)  (XLU)
    e = jnp.exp(x - x_max)                        # (TM, C)  (EUP), in (0, 1]

    # Weighted moments on the MXU: W (8, C) contracted with e (TM, C) over C
    # -> (8, TM).  Rows 0..2 are [sum(e), sum(e*a_c), sum(e*a_c^2)].
    moments = lax.dot_general(
        w_ref[...], e,
        dimension_numbers=(((1,), (1,)), ((), ())),
        preferred_element_type=jnp.float32,
        precision=lax.Precision.HIGHEST)
    s = moments[0:1, :]                           # (1, TM)
    m1 = moments[1:2, :]                          # (1, TM)
    m2 = moments[2:3, :]                          # (1, TM)

    inv_s = pl.reciprocal(s)                      # exact (1e-5 tolerance)
    mean_c = m1 * inv_s                           # centered mean
    variance = m2 * inv_s - mean_c * mean_c       # variance is shift-invariant
    diff = (mean_c + jnp.float32(age_center)) - t
    mse = diff * diff * pl.reciprocal(variance)

    if needs_mask:
        # Unclamped global row offset of this tile (duplicated / padded rows
        # land past total_n and are masked out by the select below).
        row_start = (c * pl.num_programs(1) + i) * block_rows
        is_partial = row_start + block_rows > total_n

        @pl.when(jnp.logical_not(is_partial))
        def _acc_full():
            acc_mse_ref[...] += mse
            acc_var_ref[...] += variance

        @pl.when(is_partial)
        def _acc_masked():
            col = lax.broadcasted_iota(jnp.int32, (1, block_rows), 1)
            valid = (row_start + col) < total_n
            acc_mse_ref[...] += jnp.where(valid, mse, 0.0)
            acc_var_ref[...] += jnp.where(valid, variance, 0.0)
    else:
        acc_mse_ref[...] += mse
        acc_var_ref[...] += variance

    @pl.when(i == pl.num_programs(1) - 1)
    def _finalize():
        mean_out_ref[...] = jnp.full(
            mean_out_ref.shape,
            jnp.sum(acc_mse_ref[...]) * jnp.float32(0.5 / total_n),
            jnp.float32)
        var_out_ref[...] = jnp.full(
            var_out_ref.shape,
            jnp.sum(acc_var_ref[...]) * jnp.float32(1.0 / total_n),
            jnp.float32)


def mean_variance_loss_mtl2(logits, target, start_age, end_age, *,
                            block_rows=4096):
    """Pallas TPU implementation of MeanVarianceLossMTL2.forward.

    logits: (N, C) with C == end_age - start_age + 1 (any float dtype)
    target: (N,)   (any numeric dtype; cast to f32 in-kernel, as in torch)
    returns: (mean_loss, variance_loss) f32 scalars
    """
    N, C = logits.shape
    assert C == end_age - start_age + 1, "class dim must match age range"

    # Row tile: the whole batch if it fits, otherwise a multiple of 128 so the
    # lane-dense (1, tm) target / accumulator blocks satisfy the lane rule.
    block_rows = max(128, (int(block_rows) + 127) // 128 * 128)
    tm = N if N <= block_rows else block_rows

    num_tiles = pl.cdiv(N, tm)
    n_split = 2 if num_tiles >= 2 else 1        # v7x dual-TC; no-op on 1-TC chips
    steps = pl.cdiv(num_tiles, n_split)
    needs_mask = (n_split * steps * tm) != N
    last_tile = num_tiles - 1

    # Centered ages (well-conditioned variance) + MXU moment matrix.
    ages = jnp.arange(start_age, end_age + 1, dtype=jnp.float32)
    age_center = 0.5 * float(start_age + end_age)
    ac = ages - jnp.float32(age_center)
    w = jnp.concatenate(
        [jnp.ones((1, C), jnp.float32), ac[None, :], (ac * ac)[None, :],
         jnp.zeros((5, C), jnp.float32)], axis=0)            # (8, C)

    t = target.reshape(1, N)                                 # lane-dense targets

    if n_split * steps > num_tiles:
        # Ragged split: clamp so the DMA never walks off the array; the
        # duplicated tile is fully masked in-kernel via the global row index.
        def tile_idx(c, i):
            return jnp.minimum(c * steps + i, last_tile)
    else:
        def tile_idx(c, i):
            return c * steps + i

    # Generation-aware VMEM budget (v7x: 64 MiB physical, v5e/v6e: 128 MiB).
    lanes = (C + 127) // 128 * 128
    tm_pad = (tm + 7) // 8 * 8
    vmem_needed = (2 * tm_pad * lanes * logits.dtype.itemsize  # logits dbl-buf
                   + 2 * 8 * tm * 4                            # targets dbl-buf
                   + 2 * 8 * tm * 4                            # 2 accumulators
                   + 3 * tm_pad * lanes * 4                    # f32 temporaries
                   + (4 << 20))                                # slack
    try:
        cap = int(getattr(pltpu.get_tpu_info(), "vmem_capacity_bytes", 64 << 20))
    except Exception:
        cap = 64 << 20
    vmem_bytes = int(min(max(vmem_needed, 8 << 20), int(cap * 0.75)))

    kernel = functools.partial(_mean_variance_kernel,
                               block_rows=tm, total_n=N,
                               age_center=age_center, needs_mask=needs_mask)

    mean_out, var_out = pl.pallas_call(
        kernel,
        grid=(n_split, steps),
        in_specs=[
            pl.BlockSpec((tm, C), lambda c, i: (tile_idx(c, i), 0)),   # logits
            pl.BlockSpec((1, tm), lambda c, i: (0, tile_idx(c, i))),   # targets
            pl.BlockSpec((8, C), lambda c, i: (0, 0)),                 # moment matrix
        ],
        out_specs=(
            pl.BlockSpec((1, 128), lambda c, i: (0, c)),  # per-split partial losses
            pl.BlockSpec((1, 128), lambda c, i: (0, c)),
        ),
        out_shape=(
            jax.ShapeDtypeStruct((1, n_split * 128), jnp.float32),
            jax.ShapeDtypeStruct((1, n_split * 128), jnp.float32),
        ),
        scratch_shapes=[
            pltpu.VMEM((1, tm), jnp.float32),             # running mse partials
            pltpu.VMEM((1, tm), jnp.float32),             # running variance partials
        ],
        compiler_params=pltpu.CompilerParams(
            dimension_semantics=("parallel", "arbitrary"),
            vmem_limit_bytes=vmem_bytes,
        ),
    )(logits, t, w)

    mean_loss = jnp.sum(mean_out.reshape(n_split, 128)[:, 0])
    var_loss = jnp.sum(var_out.reshape(n_split, 128)[:, 0])
    return mean_loss, var_loss


def _reference(logits, target, start_age, end_age):
    p = jax.nn.softmax(logits.astype(jnp.float32), axis=1)
    a = jnp.arange(start_age, end_age + 1, dtype=jnp.float32)
    mean = jnp.sum(p * a, axis=1)
    b = (a[None, :] - mean[:, None]) ** 2
    variance = jnp.sum(p * b, axis=1)
    mse = (mean - target.astype(jnp.float32)) ** 2 / variance
    return mse.mean() / 2.0, variance.mean()


if __name__ == "__main__":
    start_age, end_age = 0, 31          # C = 32 age bins
    C = end_age - start_age + 1
    key = jax.random.PRNGKey(0)
    ks = jax.random.split(key, 6)

    def check(N, block_rows, klog, ktgt):
        logits = jax.random.normal(klog, (N, C), dtype=jnp.float32)
        target = jax.random.randint(ktgt, (N,), start_age, end_age + 1).astype(jnp.float32)
        m, v = mean_variance_loss_mtl2(logits, target, start_age, end_age,
                                       block_rows=block_rows)
        jax.block_until_ready((m, v))
        rm, rv = _reference(logits, target, start_age, end_age)
        assert jnp.allclose(m, rm, rtol=1e-5, atol=1e-5), (N, block_rows, m, rm)
        assert jnp.allclose(v, rv, rtol=1e-5, atol=1e-5), (N, block_rows, v, rv)

    # Case 1: tiny batch, single full-array tile, n_split = 1.
    check(8, 4096, ks[0], ks[1])
    # Case 2: multi-tile, 2-way split, partial last tile + fully-masked
    #         duplicated tile (ragged split: 3 tiles over 2 splits).
    check(300, 128, ks[2], ks[3])
    # Case 3: even tile count, unmasked fast path on both splits.
    check(256, 128, ks[4], ks[5])

    print("KERNEL_OK")
</pallas_src>

<mosaic_0001>
module attributes {stable_mosaic.version = 11 : i64} {
  func.func @_mean_variance_kernel(%arg0: i32, %arg1: i32, %arg2: memref<8x32xf32, #tpu.memory_space<vmem>>, %arg3: memref<1x8xf32, #tpu.memory_space<vmem>>, %arg4: memref<8x32xf32, #tpu.memory_space<vmem>>, %arg5: memref<1x128xf32, #tpu.memory_space<vmem>>, %arg6: memref<1x128xf32, #tpu.memory_space<vmem>>, %arg7: memref<1x8xf32, #tpu.memory_space<vmem>>, %arg8: memref<1x8xf32, #tpu.memory_space<vmem>>) attributes {dimension_semantics = [#tpu.dimension_semantics<parallel>, #tpu.dimension_semantics<arbitrary>], iteration_bounds = array<i64: 1, 1>, scalar_prefetch = 0 : i64, scratch_operands = 2 : i64, tpu.core_type = #tpu.core_type<tc>, window_params = [{transform_indices = @transform_0, window_bounds = array<i64: 8, 32>}, {transform_indices = @transform_1, window_bounds = array<i64: 1, 8>}, {pipeline_mode = #tpu.pipeline_mode<synchronous>, transform_indices = @transform_2, window_bounds = array<i64: 8, 32>}, {transform_indices = @transform_3, window_bounds = array<i64: 1, 128>}, {transform_indices = @transform_4, window_bounds = array<i64: 1, 128>}]} {
    %c0_i32 = arith.constant 0 : i32
    %0 = arith.cmpi eq, %arg1, %c0_i32 : i32
    %1 = arith.extui %0 : i1 to i32
    %c0_i32_0 = arith.constant 0 : i32
    %2 = arith.cmpi ne, %1, %c0_i32_0 : i32
    scf.if %2 {
      %cst_18 = arith.constant 0.000000e+00 : f32
      %35 = vector.broadcast %cst_18 : f32 to vector<1x8xf32>
      %c0_19 = arith.constant 0 : index
      %c0_20 = arith.constant 0 : index
      %36 = vector.load %arg7[%c0_19, %c0_20] : memref<1x8xf32, #tpu.memory_space<vmem>>, vector<1x8xf32>
      tpu.vector_store %arg7[%c0_19, %c0_20], %35 {strides = array<i32>} : memref<1x8xf32, #tpu.memory_space<vmem>>, vector<1x8xf32>,
      %cst_21 = arith.constant 0.000000e+00 : f32
      %37 = vector.broadcast %cst_21 : f32 to vector<1x8xf32>
      %c0_22 = arith.constant 0 : index
      %c0_23 = arith.constant 0 : index
      %38 = vector.load %arg8[%c0_22, %c0_23] : memref<1x8xf32, #tpu.memory_space<vmem>>, vector<1x8xf32>
      tpu.vector_store %arg8[%c0_22, %c0_23], %37 {strides = array<i32>} : memref<1x8xf32, #tpu.memory_space<vmem>>, vector<1x8xf32>,
    } else {
    }
    %c0 = arith.constant 0 : index
    %c0_1 = arith.constant 0 : index
    %3 = vector.load %arg2[%c0, %c0_1] : memref<8x32xf32, #tpu.memory_space<vmem>>, vector<8x32xf32>
    %c0_2 = arith.constant 0 : index
    %c0_3 = arith.constant 0 : index
    %4 = vector.load %arg3[%c0_2, %c0_3] : memref<1x8xf32, #tpu.memory_space<vmem>>, vector<1x8xf32>
    %cst = arith.constant dense<0xFF800000> : vector<8xf32>
    %5 = vector.multi_reduction <maximumf>, %3, %cst [1] : vector<8x32xf32> to vector<8xf32>
    %6 = vector.shape_cast %5 : vector<8xf32> to vector<8x1xf32>
    %7 = vector.broadcast %6 : vector<8x1xf32> to vector<8x32xf32>
    %8 = arith.subf %3, %7 : vector<8x32xf32>
    %9 = math.exp %8 : vector<8x32xf32>
    %c0_4 = arith.constant 0 : index
    %c0_5 = arith.constant 0 : index
    %10 = vector.load %arg4[%c0_4, %c0_5] : memref<8x32xf32, #tpu.memory_space<vmem>>, vector<8x32xf32>
    %cst_6 = arith.constant dense<0.000000e+00> : vector<8x8xf32>
    %11 = tpu.matmul %10, %9, %cst_6 {dimension_numbers = #tpu.dot_dimension_numbers<[1], [1], [0], [0], [0, 0, 1, 0], [], []>, precision = #tpu.contract_precision<fp32>} : vector<8x32xf32>, vector<8x32xf32>, vector<8x8xf32> -> vector<8x8xf32>
    %12 = vector.extract_strided_slice %11 {offsets = [0, 0], sizes = [1, 8], strides = [1, 1]} : vector<8x8xf32> to vector<1x8xf32>
    %13 = vector.extract_strided_slice %11 {offsets = [1, 0], sizes = [1, 8], strides = [1, 1]} : vector<8x8xf32> to vector<1x8xf32>
    %14 = vector.extract_strided_slice %11 {offsets = [2, 0], sizes = [1, 8], strides = [1, 1]} : vector<8x8xf32> to vector<1x8xf32>
    %15 = tpu.reciprocal %12 : vector<1x8xf32> -> vector<1x8xf32>
    %16 = arith.mulf %13, %15 : vector<1x8xf32>
    %17 = arith.mulf %14, %15 : vector<1x8xf32>
    %18 = arith.mulf %16, %16 : vector<1x8xf32>
    %19 = arith.subf %17, %18 : vector<1x8xf32>
    %cst_7 = arith.constant 1.550000e+01 : f32
    %20 = vector.broadcast %cst_7 : f32 to vector<1x8xf32>
    %21 = arith.addf %16, %20 : vector<1x8xf32>
    %22 = arith.subf %21, %4 : vector<1x8xf32>
    %23 = arith.mulf %22, %22 : vector<1x8xf32>
    %24 = tpu.reciprocal %19 : vector<1x8xf32> -> vector<1x8xf32>
    %25 = arith.mulf %23, %24 : vector<1x8xf32>
    %c0_8 = arith.constant 0 : index
    %c0_9 = arith.constant 0 : index
    %26 = vector.load %arg7[%c0_8, %c0_9] : memref<1x8xf32, #tpu.memory_space<vmem>>, vector<1x8xf32>
    %27 = arith.addf %26, %25 : vector<1x8xf32>
    %c0_10 = arith.constant 0 : index
    %c0_11 = arith.constant 0 : index
    %28 = vector.load %arg7[%c0_10, %c0_11] : memref<1x8xf32, #tpu.memory_space<vmem>>, vector<1x8xf32>
    tpu.vector_store %arg7[%c0_10, %c0_11], %27 {strides = array<i32>} : memref<1x8xf32, #tpu.memory_space<vmem>>, vector<1x8xf32>,
    %c0_12 = arith.constant 0 : index
    %c0_13 = arith.constant 0 : index
    %29 = vector.load %arg8[%c0_12, %c0_13] : memref<1x8xf32, #tpu.memory_space<vmem>>, vector<1x8xf32>
    %30 = arith.addf %29, %19 : vector<1x8xf32>
    %c0_14 = arith.constant 0 : index
    %c0_15 = arith.constant 0 : index
    %31 = vector.load %arg8[%c0_14, %c0_15] : memref<1x8xf32, #tpu.memory_space<vmem>>, vector<1x8xf32>
    tpu.vector_store %arg8[%c0_14, %c0_15], %30 {strides = array<i32>} : memref<1x8xf32, #tpu.memory_space<vmem>>, vector<1x8xf32>,
    %c0_i32_16 = arith.constant 0 : i32
    %32 = arith.cmpi eq, %arg1, %c0_i32_16 : i32
    %33 = arith.extui %32 : i1 to i32
    %c0_i32_17 = arith.constant 0 : i32
    %34 = arith.cmpi ne, %33, %c0_i32_17 : i32
    scf.if %34 {
      %c0_18 = arith.constant 0 : index
      %c0_19 = arith.constant 0 : index
      %35 = vector.load %arg7[%c0_18, %c0_19] : memref<1x8xf32, #tpu.memory_space<vmem>>, vector<1x8xf32>
      %36 = vector.shape_cast %35 : vector<1x8xf32> to vector<1x1x8xf32>
      %cst_20 = arith.constant dense<0.000000e+00> : vector<1xf32>
      %37 = vector.multi_reduction <add>, %36, %cst_20 [1, 2] : vector<1x1x8xf32> to vector<1xf32>
      %38 = vector.shape_cast %37 : vector<1xf32> to vector<1x1x1xf32>
      %39 = vector.extract %38[0, 0, 0] : f32 from vector<1x1x1xf32>
      %cst_21 = arith.constant 6.250000e-02 : f32
      %40 = arith.mulf %39, %cst_21 : f32
      %41 = vector.broadcast %40 : f32 to vector<1x128xf32>
      %c0_22 = arith.constant 0 : index
      %c0_23 = arith.constant 0 : index
      %42 = vector.load %arg5[%c0_22, %c0_23] : memref<1x128xf32, #tpu.memory_space<vmem>>, vector<1x128xf32>
      tpu.vector_store %arg5[%c0_22, %c0_23], %41 {strides = array<i32>} : memref<1x128xf32, #tpu.memory_space<vmem>>, vector<1x128xf32>,
      %c0_24 = arith.constant 0 : index
      %c0_25 = arith.constant 0 : index
      %43 = vector.load %arg8[%c0_24, %c0_25] : memref<1x8xf32, #tpu.memory_space<vmem>>, vector<1x8xf32>
      %44 = vector.shape_cast %43 : vector<1x8xf32> to vector<1x1x8xf32>
      %cst_26 = arith.constant dense<0.000000e+00> : vector<1xf32>
      %45 = vector.multi_reduction <add>, %44, %cst_26 [1, 2] : vector<1x1x8xf32> to vector<1xf32>
      %46 = vector.shape_cast %45 : vector<1xf32> to vector<1x1x1xf32>
      %47 = vector.extract %46[0, 0, 0] : f32 from vector<1x1x1xf32>
      %cst_27 = arith.constant 1.250000e-01 : f32
      %48 = arith.mulf %47, %cst_27 : f32
      %49 = vector.broadcast %48 : f32 to vector<1x128xf32>
      %c0_28 = arith.constant 0 : index
      %c0_29 = arith.constant 0 : index
      %50 = vector.load %arg6[%c0_28, %c0_29] : memref<1x128xf32, #tpu.memory_space<vmem>>, vector<1x128xf32>
      tpu.vector_store %arg6[%c0_28, %c0_29], %49 {strides = array<i32>} : memref<1x128xf32, #tpu.memory_space<vmem>>, vector<1x128xf32>,
    } else {
    }
    return
  }
  func.func @transform_0(%arg0: i32, %arg1: i32) -> (i32, i32) {
    %c1_i32 = arith.constant 1 : i32
    %0 = arith.muli %arg0, %c1_i32 : i32
    %1 = arith.addi %0, %arg1 : i32
    %c0_i32 = arith.constant 0 : i32
    %c0_i32_0 = arith.constant 0 : i32
    return %1, %c0_i32 : i32, i32
  }
  func.func @transform_1(%arg0: i32, %arg1: i32) -> (i32, i32) {
    %c1_i32 = arith.constant 1 : i32
    %0 = arith.muli %arg0, %c1_i32 : i32
    %1 = arith.addi %0, %arg1 : i32
    %c0_i32 = arith.constant 0 : i32
    %c0_i32_0 = arith.constant 0 : i32
    return %c0_i32, %1 : i32, i32
  }
  func.func @transform_2(%arg0: i32, %arg1: i32) -> (i32, i32) {
    %c0_i32 = arith.constant 0 : i32
    %c0_i32_0 = arith.constant 0 : i32
    %c0_i32_1 = arith.constant 0 : i32
    return %c0_i32, %c0_i32_0 : i32, i32
  }
  func.func @transform_3(%arg0: i32, %arg1: i32) -> (i32, i32) {
    %c0_i32 = arith.constant 0 : i32
    %c0_i32_0 = arith.constant 0 : i32
    return %c0_i32, %arg0 : i32, i32
  }
  func.func @transform_4(%arg0: i32, %arg1: i32) -> (i32, i32) {
    %c0_i32 = arith.constant 0 : i32
    %c0_i32_0 = arith.constant 0 : i32
    return %c0_i32, %arg0 : i32, i32
  }
}

</mosaic_0001>

<bundles_post_ra>
// kernel: tpu_custom_call.1
= control target key start
LH: loop header
LB: loop body
LE: loop exit
PB: predicated region body
PF: predicated region fallthrough
CT: control target
= control target key end

     0   :  { %10 = vsyncpa [#allocation5], 0  ;;  %s932_s0 = inlined_call_operand.hbm [shape: f32[8,32], index: 0, kind: input, shape index: {}]   ;;  %s933_s1 = inlined_call_operand.vmem [shape: f32[1,8], index: 1, kind: input, shape index: {}]   ;;  %s934_s2 = inlined_call_operand.hbm [shape: f32[8,32], index: 2, kind: input, shape index: {}]   ;;  %s935_s3 = inlined_call_operand.hbm [shape: f32[1,128], index: 3, kind: output, shape index: {0}]   ;;  %s936_s4 = inlined_call_operand.hbm [shape: f32[1,128], index: 4, kind: output, shape index: {1}]  }
   0x1   :  { %11 = vsyncpa [#allocation8], 0 }
   0x2   :  { %12 = vsyncpa [#allocation6], 0 }
   0x3   :  { %13 = vsyncpa [#allocation11], 0  ;;  %s826_s15 = smov [#allocation4]   ;;  %s827_s17 = smov [#allocation7]  }
   0x4   :  { %s23_s16 = sshll.u32 %s826_s15, 4  ;;  %s40_s18 = sshll.u32 %s827_s17, 4  ;;  %s24_s16 = int_to_ptr.vmem [resolvable:$true] %s23_s16  ;;  %s41_s18 = int_to_ptr.vmem [resolvable:$true] %s40_s18 }
   0x5   :  { %s730_s21 = scalar_lea.hbm %s932_s0, 128 }
   0x6   :  { %p731_p0 = scmp.ne.s32.totalorder %s932_s0, %s730_s21  ;;  %p734_p1 = scmp.lt.u32.totalorder %s730_s21, %s932_s0 }
   0x8   :  { %p736_p2 = pnand %p734_p1, %p731_p0 }
   0xa   :  { %739 = shalt.err (!%p736_p2)
}
   0xb   :  { %s740_s26 = scalar_lea.vmem %s24_s16, 128  ;;  %p745_p4 = scmp.lt.s32.totalorder %s24_s16, %s24_s16 }
   0xc   :  { %p741_p3 = scmp.ne.s32.totalorder %s24_s16, %s740_s26  ;;  %p746_p5 = scmp.lt.s32.totalorder %s740_s26, %s740_s26 }
   0xe   :  { %p747_p6 = por %p746_p5, %p745_p4 }
  0x10   :  { %p748_p7 = pnand %p747_p6, %p741_p3 }
  0x12   :  { %751 = shalt.err (!%p748_p7)
}
  0x13   :  { %26 = dma.hbm_to_vmem [thread:$0]  %s932_s0, 128, %s24_s16, [#allocation5]  }
  0x14   :  { %s752_s5 = scalar_lea.hbm %s934_s2, 128 }
  0x15   :  { %p753_p8 = scmp.ne.s32.totalorder %s934_s2, %s752_s5  ;;  %p756_p9 = scmp.lt.u32.totalorder %s752_s5, %s934_s2 }
  0x17   :  { %p758_p10 = pnand %p756_p9, %p753_p8 }
  0x19   :  { %761 = shalt.err (!%p758_p10)
}
  0x1a   :  { %s762_s10 = scalar_lea.vmem %s41_s18, 128  ;;  %p767_p12 = scmp.lt.s32.totalorder %s41_s18, %s41_s18 }
  0x1b   :  { %p763_p11 = scmp.ne.s32.totalorder %s41_s18, %s762_s10  ;;  %p768_p13 = scmp.lt.s32.totalorder %s762_s10, %s762_s10 }
  0x1d   :  { %p769_p0 = por %p768_p13, %p767_p12 }
  0x1f   :  { %p770_p1 = pnand %p769_p0, %p763_p11 }
  0x21   :  { %773 = shalt.err (!%p770_p1)
}
  0x22   :  { %43 = dma.hbm_to_vmem [thread:$0]  %s934_s2, 128, %s41_s18, [#allocation8]  }
  0x23   :  { %818 = dma.done.wait [#allocation5], 128  }
  0x24   :  { %819 = vsyncadd [#allocation5], 4294967168 }
  0x25   :  { %820 = dma.done.wait [#allocation8], 128  }
  0x26   :  { %821 = vsyncadd [#allocation8], 4294967168  ;;  %vm69_vm0 = vcmask 261120   ;;  %v67_v0 = vld [vmem:[#allocation4] sm:$0xff]  ;;  %v828_v2 = vmov 0.0   ;;  %vm829_vm1 = vmmov 0   ;;  %v561_v27 = vlaneseq }
  0x27   :  { %v70_v1 = vsel %vm69_vm0, %v67_v0, -inf  ;;  %674 = vmatprep.subr.mxu1 %v828_v2  ;;  %689 = vmatprep.subr.mxu0 %v828_v2  ;;  %v76_v3 = vld [vmem:[#allocation7] sm:$0xff]  ;;  %vm64_vm2 = vcmask 57344   ;;  %v830_v25 = vmov 1966171168   ;;  %s832_s15 = smov [#allocation10]  }
  0x28   :  { %71 = vmax.xlane.f32.xlu0 %v70_v1  ;;  %676 = vmatprep.mubr.msk.f32.mxu1 %vm829_vm1, %v828_v2  ;;  %v78_v4 = vsel %vm69_vm0, %v76_v3, 0  ;;  %66 = vst.msk [vmem:[#allocation3] sm:$0x1] %vm64_vm2, %v828_v2  ;;  %65 = vst.msk [vmem:[#allocation2] sm:$0x1] %vm64_vm2, %v828_v2  ;;  %v559_v26 = vunpack.c.l.s4 %v830_v25  ;;  %v562_v33 = vshrl.u32 %v561_v27, 7 }
  0x29   :  { %691 = vmatprep.mubr.msk.f32.mxu0 %vm829_vm1, %v828_v2  ;;  %v149_v7 = vand.u32 4294901760, %v78_v4  ;;  %v661_v43 = vld [vmem:[%s933_s1] ss:$0 sm:$0xff]  ;;  %s831_s1 = smov [#allocation9]   ;;  %s644_s16 = sshll.u32 %s832_s15, 4  ;;  %s900_s16 = int_to_ptr.vmem [resolvable:$true] %s644_s16 }
  0x2a   :  { %v560_v32 = vunpack.c.0.s8 %v559_v26  ;;  %s634_s13 = sshll.u32 %s831_s1, 4  ;;  %s635_s13 = int_to_ptr.vmem [resolvable:$true] %s634_s13 }
  0x2b   :  { %v150_v9 = vsub.f32 %v78_v4, %v149_v7  ;;  %s774_s20 = scalar_lea.vmem %s635_s13, 16  ;;  %s778_s21 = scalar_lea.vmem %s635_s13, 32 }
  0x2c   :  { %v563_v37 = vsub.s32 %v560_v32, %v562_v33  ;;  %p775_p2 = scmp.ne.s32.totalorder %s635_s13, %s774_s20  ;;  %p779_p3 = scmp.lt.s32.totalorder %s635_s13, %s635_s13 }
  0x2d   :  { %v151_v10 = vand.u32 4294901760, %v150_v9  ;;  %p780_p4 = scmp.lt.s32.totalorder %s778_s21, %s774_s20 }
  0x2f   :  { %v152_v11 = vsub.f32 %v150_v9, %v151_v10  ;;  %v577_v42 = vld [vmem:[#allocation3] sm:$0x1]  ;;  %v556_v55 = vld [vmem:[#allocation2] sm:$0x1]  ;;  %p781_p5 = por %p780_p4, %p779_p3 }
  0x31   :  { %v153_v15 = vand.u32 4294901760, %v152_v11  ;;  %p782_p6 = pnand %p781_p5, %p775_p2 }
  0xb5   :  { %v72_v5 = vpop.xlane.xlu0 %71 }
  0xb6   :  { %v73_v6 = vsub.f32 %v67_v0, %v72_v5 }
  0xb8   :  { %v74_v8 = vmul.f32 1.442695, %v73_v6 }
  0xba   :  { %724 = vpow2.f32 %v74_v8 }
  0xc4   :  { %v725_v12 = vpop.eup %724 }
  0xc5   :  { %v81_v13 = vsel %vm69_vm0, %v725_v12, 0 }
  0xc6   :  { %v84_v14 = vand.u32 4294901760, %v81_v13 }
  0xc8   :  { %675 = vmatpush3.xpose.msra.mxu1 %v84_v14  ;;  %v161_v16 = vsub.f32 %v81_v13, %v84_v14  ;;  %690 = vmatpush3.xpose.msra.mxu0 %v84_v14 }
  0xc9   :  { %694 = vmatprep.subr.mxu0 %v828_v2  ;;  %679 = vmatprep.subr.mxu1 %v828_v2 }
  0xca   :  { %v162_v17 = vand.u32 4294901760, %v161_v16 }
  0xcb   :  { %677 = vmatmul.mubr.f32.vlgmr.msra.gmra.mrb[0].mxu1 %v153_v15  ;;  %692 = vmatmul.mubr.f32.vlgmr.msra.gmra.mrb[0].mxu0 %v151_v10 }
  0xcc   :  { %695 = vmatpush3.xpose.msra.mxu0 %v162_v17  ;;  %v163_v18 = vsub.f32 %v161_v16, %v162_v17  ;;  %681 = vmatprep.mubr.msk.f32.mxu1 %vm829_vm1, %v828_v2 }
  0xcd   :  { %696 = vmatprep.mubr.msk.f32.mxu0 %vm829_vm1, %v828_v2  ;;  %699 = vmatprep.subr.mxu0 %v828_v2 }
  0xce   :  { %v164_v19 = vand.u32 4294901760, %v163_v18 }
  0xd0   :  { %680 = vmatpush3.xpose.msra.mxu1 %v164_v19 }
  0xd1   :  { %684 = vmatprep.subr.mxu1 %v828_v2 }
  0xd3   :  { %682 = vmatmul.mubr.f32.vlgmr.msra.gmra.mrb[0].mxu1 %v149_v7  ;;  %697 = vmatmul.mubr.f32.vlgmr.msra.gmra.mrb[0].mxu0 %v149_v7 }
  0xd4   :  { %700 = vmatpush3.xpose.msra.mxu0 %v84_v14  ;;  %685 = vmatpush3.xpose.msra.mxu1 %v161_v16 }
  0xd5   :  { %686 = vmatprep.mubr.msk.f32.mxu1 %vm829_vm1, %v828_v2  ;;  %701 = vmatprep.mubr.msk.f32.mxu0 %vm829_vm1, %v828_v2 }
  0xdb   :  { %687 = vmatmul.mubr.f32.vlgmr.msra.gmra.mrb[0].mxu1 %v150_v9  ;;  %702 = vmatmul.mubr.f32.vlgmr.msra.gmra.mrb[0].mxu0 %v149_v7 }
 0x1ae   :  { %v305_v20 = vpop.f32.mrb[0].mxu1  ;;  %v525_v21 = vpop.f32.mrb[0].mxu0 }
 0x1af   :  { %v704_v22 = vadd.f32 %v525_v21, %v305_v20  ;;  %v688_v23 = vpop.f32.mrb[1].mxu1  ;;  %v703_v24 = vpop.f32.mrb[1].mxu0 }
 0x1b1   :  { %726 = vrcp.f32 %v704_v22 }
 0x1bb   :  { %v727_v28 = vpop.eup %726 }
 0x1bc   :  { %v531_v29 = vrot.slane %v727_v28, 7  ;;  %v534_v31 = vrot.slane %v727_v28, 6 }
 0x1be   :  { %v533_v30 = vmul.f32 %v704_v22, %v531_v29  ;;  %v536_v35 = vmul.f32 %v704_v22, %v534_v31 }
 0x1c0   :  { %v537_v34 = vmul.f32 %v533_v30, %v533_v30  ;;  %v542_v41 = vadd.f32 15.5, %v533_v30 }
 0x1c2   :  { %v539_v36 = vrot.slane %v537_v34, 7  ;;  %v549_v46 = vsub.f32 %v542_v41, %v661_v43 }
 0x1c4   :  { %v541_v38 = vsub.f32 %v536_v35, %v539_v36  ;;  %v550_v48 = vmul.f32 %v549_v46, %v549_v46 }
 0x1c6   :  { %728 = vrcp.f32 %v541_v38  ;;  %v585_v39 = vrot.slane %v541_v38, %v563_v37 }
 0x1c8   :  { %v592_v40 = vrot.slane %v585_v39, %v563_v37 }
 0x1ca   :  { %v593_v44 = vcombine.high %v592_v40, %v592_v40 }
 0x1cc   :  { %v595_v45 = vadd.f32 %v593_v44, %v577_v42 }
 0x1ce   :  { %596 = vst.msk [vmem:[#allocation3] sm:$0x1] %vm64_vm2, %v595_v45 }
 0x1d0   :  { %v729_v47 = vpop.eup %728 }
 0x1d1   :  { %v553_v49 = vrot.slane %v729_v47, 1 }
 0x1d3   :  { %v555_v50 = vmul.f32 %v553_v49, %v550_v48 }
 0x1d5   :  { %v564_v51 = vrot.slane %v555_v50, %v563_v37  ;;  %v614_v52 = vld [vmem:[#allocation3] sm:$0x1] }
 0x1d6   :  { %v615_v53 = vsel %vm64_vm2, %v614_v52, 0.0 }
 0x1d7   :  { %v565_v54 = vcombine.high %v564_v51, %v564_v51  ;;  %616 = vadd.xlane.f32.xlu1 %v615_v53 }
 0x1d9   :  { %v572_v56 = vrot.slane %v565_v54, %v563_v37 }
 0x1db   :  { %v574_v57 = vadd.f32 %v572_v56, %v556_v55 }
 0x1dd   :  { %576 = vst.msk [vmem:[#allocation2] sm:$0x1] %vm64_vm2, %v574_v57 }
 0x1e4   :  { %v600_v58 = vld [vmem:[#allocation2] sm:$0x1] }
 0x1e5   :  { %v601_v59 = vsel %vm64_vm2, %v600_v58, 0.0 }
 0x1e6   :  { %602 = vadd.xlane.f32.xlu0 %v601_v59 }
 0x264   :  { %v617_v60 = vpop.xlane.xlu1 %616 }
 0x265   :  { %v618_v61 = vrot.slane %v617_v60, 4 }
 0x267   :  { %v619_v62 = vadd.f32 %v618_v61, %v617_v60 }
 0x269   :  { %v620_v63 = vrot.slane %v619_v62, 2 }
 0x26b   :  { %v621_v3 = vadd.f32 %v620_v63, %v619_v62 }
 0x26d   :  { %v622_v6 = vrot.slane %v621_v3, 1 }
 0x26f   :  { %v623_v9 = vadd.f32 %v622_v6, %v621_v3 }
 0x273   :  { %v603_v0 = vpop.xlane.xlu0 %602 }
 0x274   :  { %v604_v1 = vrot.slane %v603_v0, 4 }
 0x276   :  { %v605_v2 = vadd.f32 %v604_v1, %v603_v0 }
 0x278   :  { %v606_v4 = vrot.slane %v605_v2, 2 }
 0x27a   :  { %v607_v5 = vadd.f32 %v606_v4, %v605_v2 }
 0x27c   :  { %v608_v7 = vrot.slane %v607_v5, 1 }
 0x27e   :  { %v609_v8 = vadd.f32 %v608_v7, %v607_v5 }
 0x280   :  { %713 = vpush %v609_v8 }
 0x281   :  { %715 = vpush %v623_v9 }
 0x2b1   :  { %s714_s14 = spop %713 }
 0x2b2   :  { %s611_s17 = smul.f32 0.0625, %s714_s14  ;;  %s716_s18 = spop %715 }
 0x2b3   :  { %s625_s19 = smul.f32 0.125, %s716_s18 }
 0x2b4   :  { %v612_v10 = vstv %s611_s17 }
 0x2b5   :  { %613 = vst [vmem:[#allocation9] sm:$0x1] %v612_v10  ;;  %v626_v11 = vstv %s625_s19 }
 0x2b6   :  { %627 = vst [vmem:[#allocation10] sm:$0x1] %v626_v11 }
 0x2b7   :  { %785 = shalt.err (!%p782_p6)
}
 0x2b8   :  { %s786_s24 = scalar_lea.hbm %s935_s3, 16 }
 0x2b9   :  { %p787_p7 = scmp.ne.s32.totalorder %s935_s3, %s786_s24  ;;  %p790_p8 = scmp.lt.u32.totalorder %s786_s24, %s935_s3 }
 0x2bb   :  { %p792_p9 = pnand %p790_p8, %p787_p7 }
 0x2bd   :  { %795 = shalt.err (!%p792_p9)
}
 0x2be   :  { %637 = dma.vmem_to_hbm [thread:$0]  %s635_s13, 16, %s935_s3, [#allocation6]  }
 0x2bf   :  { %s796_s5 = scalar_lea.vmem %s900_s16, 16  ;;  %s800_s6 = scalar_lea.vmem %s900_s16, 32 }
 0x2c0   :  { %p797_p10 = scmp.ne.s32.totalorder %s900_s16, %s796_s5  ;;  %p801_p11 = scmp.lt.s32.totalorder %s900_s16, %s900_s16 }
 0x2c1   :  { %p802_p12 = scmp.lt.s32.totalorder %s800_s6, %s796_s5 }
 0x2c3   :  { %p803_p13 = por %p802_p12, %p801_p11 }
 0x2c5   :  { %p804_p0 = pnand %p803_p13, %p797_p10 }
 0x2c7   :  { %807 = shalt.err (!%p804_p0)
}
 0x2c8   :  { %s808_s9 = scalar_lea.hbm %s936_s4, 16 }
 0x2c9   :  { %p809_p1 = scmp.ne.s32.totalorder %s936_s4, %s808_s9  ;;  %p812_p2 = scmp.lt.u32.totalorder %s808_s9, %s936_s4 }
 0x2cb   :  { %p814_p3 = pnand %p812_p2, %p809_p1 }
 0x2cd   :  { %817 = shalt.err (!%p814_p3)
}
 0x2ce   :  { %647 = dma.vmem_to_hbm [thread:$0]  %s900_s16, 16, %s936_s4, [#allocation11]  }
 0x2cf   :  { %822 = dma.done.wait [#allocation6], 16  }
 0x2d0   :  { %823 = vsyncadd [#allocation6], 4294967280 }
 0x2d1   :  { %824 = dma.done.wait [#allocation11], 16  }
 0x2d2   :  { %825 = vsyncadd [#allocation11], 4294967280 }
 0x2d3   :  { %654 = vsyncpa [#allocation5], 1 }
 0x2d4   :  { %655 = vsyncpa [#allocation8], 1 }
 0x2d5   :  { %656 = vsyncpa [#allocation6], 1 }
 0x2d6   :  { %657 = vsyncpa [#allocation11], 1 }

</bundles_post_ra>
